<compile_context>
chip_gen: v7x
topology: tpu7x:2x2x1
jax: 0.10.0
libtpu: 0.0.40
codegen_flags: <defaults>
</compile_context>

<pallas_src>
import jax
import jax.numpy as jnp
from jax import lax
from jax.experimental import pallas as pl
from jax.experimental.pallas import tpu as pltpu


def _qk_kernel(x_ref, wqk_ref, bqk_ref, o_ref):
    x = x_ref[...]                                    # [B, D]
    D = wqk_ref.shape[1] // 2

    # Single fused matmul: one MXU issue produces both q and k ([B, 2D]).
    y = jnp.dot(x, wqk_ref[...], preferred_element_type=jnp.float32) + bqk_ref[...]
    q = y[:, :D]                                      # [B, D] (tile-aligned slice)
    k = y[:, D:]                                      # [B, D]

    B = x.shape[0]
    if B == 1:
        # q @ k^T at B=1 is just a D-length dot product: VPU mul + XLU row
        # reduce in otherwise-idle slots; no transpose, no third MXU pass.
        o_ref[...] = jnp.sum(q * k, axis=-1, keepdims=True).astype(o_ref.dtype)
    else:
        # General batched case: contract last dims of both sides directly so
        # no k^T is materialized in VMEM.
        o_ref[...] = lax.dot_general(
            q, k, (((1,), (1,)), ((), ())),
            preferred_element_type=jnp.float32).astype(o_ref.dtype)


def fuse_qk_params(wq, bq, wk, bk):
    """One-time parameter prep (NOT in the per-call hot path).

    wq/wk: [D_out, D_in] (PyTorch Linear layout); bq/bk: [D_out].
    Returns w_qk: [D_in, 2*D_out], b_qk: [1, 2*D_out].
    """
    w_qk = jnp.concatenate([wq.T, wk.T], axis=1)
    b_qk = jnp.concatenate([bq, bk]).reshape(1, -1)
    return w_qk, b_qk


def qk_attention_scores(x, w_qk, b_qk):
    """x: [B, D]; w_qk: [D, 2D] fused weight; b_qk: [1, 2D] fused bias."""
    B, D = x.shape
    # Whole problem (~165 KiB at B=1, D=128) fits in VMEM -> single grid
    # point, full-array blocks.  (If B/D are ever scaled up, add a grid with
    # a "parallel" batch axis and re-check the (8,128) block rule + VMEM.)
    full = lambda shape: pl.BlockSpec(shape, lambda: (0,) * len(shape),
                                      memory_space=pltpu.VMEM)
    return pl.pallas_call(
        _qk_kernel,
        out_shape=jax.ShapeDtypeStruct((B, B), jnp.float32),
        in_specs=[full(x.shape), full(w_qk.shape), full(b_qk.shape)],
        out_specs=full((B, B)),
    )(x, w_qk, b_qk)


def reference(x, wq, bq, wk, bk):
    q = x @ wq.T + bq
    k = x @ wk.T + bk
    return q @ k.T


if __name__ == "__main__":
    D = 128
    B = 1  # matches the module's x1 = torch.randn(1, 128)

    key = jax.random.PRNGKey(0)
    kx, kwq, kbq, kwk, kbk = jax.random.split(key, 5)

    # Deterministic params (PyTorch Linear default: U(-1/sqrt(fan_in), +1/sqrt(fan_in)))
    bound = 1.0 / jnp.sqrt(jnp.float32(D))
    x  = jax.random.normal(kx, (B, D), dtype=jnp.float32)
    wq = jax.random.uniform(kwq, (D, D), minval=-bound, maxval=bound, dtype=jnp.float32)
    bq = jax.random.uniform(kbq, (D,),   minval=-bound, maxval=bound, dtype=jnp.float32)
    wk = jax.random.uniform(kwk, (D, D), minval=-bound, maxval=bound, dtype=jnp.float32)
    bk = jax.random.uniform(kbk, (D,),   minval=-bound, maxval=bound, dtype=jnp.float32)

    # One-time weight fusion (kept out of the per-call path).
    w_qk, b_qk = fuse_qk_params(wq, bq, wk, bk)
    w_qk, b_qk = jax.block_until_ready((w_qk, b_qk))

    out = qk_attention_scores(x, w_qk, b_qk)
    out = jax.block_until_ready(out)

    ref = reference(x, wq, bq, wk, bk)
    assert out.shape == (B, B), out.shape
    assert jnp.allclose(out, ref, atol=1e-4, rtol=1e-4), (out, ref)

    print("KERNEL_OK")
</pallas_src>

<mosaic_0001>
module attributes {stable_mosaic.version = 11 : i64} {
  func.func @_qk_kernel(%arg0: memref<1x128xf32, #tpu.memory_space<vmem>>, %arg1: memref<128x256xf32, #tpu.memory_space<vmem>>, %arg2: memref<1x256xf32, #tpu.memory_space<vmem>>, %arg3: memref<1x1xf32, #tpu.memory_space<vmem>>) attributes {dimension_semantics = [], scalar_prefetch = 0 : i64, scratch_operands = 0 : i64, tpu.core_type = #tpu.core_type<tc>} {
    %c0 = arith.constant 0 : index
    %c0_0 = arith.constant 0 : index
    %0 = vector.load %arg0[%c0, %c0_0] : memref<1x128xf32, #tpu.memory_space<vmem>>, vector<1x128xf32>
    %c0_1 = arith.constant 0 : index
    %c0_2 = arith.constant 0 : index
    %1 = vector.load %arg1[%c0_1, %c0_2] : memref<128x256xf32, #tpu.memory_space<vmem>>, vector<128x256xf32>
    %cst = arith.constant dense<0.000000e+00> : vector<1x256xf32>
    %2 = tpu.matmul %0, %1, %cst {dimension_numbers = #tpu.dot_dimension_numbers<[1], [0], [0], [1], [0, 0, 1, 1], [], []>} : vector<1x128xf32>, vector<128x256xf32>, vector<1x256xf32> -> vector<1x256xf32>
    %c0_3 = arith.constant 0 : index
    %c0_4 = arith.constant 0 : index
    %3 = vector.load %arg2[%c0_3, %c0_4] : memref<1x256xf32, #tpu.memory_space<vmem>>, vector<1x256xf32>
    %4 = arith.addf %2, %3 : vector<1x256xf32>
    %5 = vector.extract_strided_slice %4 {offsets = [0, 0], sizes = [1, 128], strides = [1, 1]} : vector<1x256xf32> to vector<1x128xf32>
    %6 = vector.extract_strided_slice %4 {offsets = [0, 128], sizes = [1, 128], strides = [1, 1]} : vector<1x256xf32> to vector<1x128xf32>
    %7 = arith.mulf %5, %6 : vector<1x128xf32>
    %cst_5 = arith.constant dense<0.000000e+00> : vector<1xf32>
    %8 = vector.multi_reduction <add>, %7, %cst_5 [1] : vector<1x128xf32> to vector<1xf32>
    %9 = vector.shape_cast %8 : vector<1xf32> to vector<1x1xf32>
    %c0_6 = arith.constant 0 : index
    %c0_7 = arith.constant 0 : index
    %10 = vector.load %arg3[%c0_6, %c0_7] : memref<1x1xf32, #tpu.memory_space<vmem>>, vector<1x1xf32>
    tpu.vector_store %arg3[%c0_6, %c0_7], %9 {strides = array<i32>} : memref<1x1xf32, #tpu.memory_space<vmem>>, vector<1x1xf32>,
    return
  }
}

</mosaic_0001>

<bundles_post_ra>
// kernel: tpu_custom_call.1
= control target key start
LH: loop header
LB: loop body
LE: loop exit
PB: predicated region body
PF: predicated region fallthrough
CT: control target
= control target key end

     0   :  { %8 = vsyncpa [#allocation3], 0  ;;  %s362_s0 = inlined_call_operand.hbm [shape: f32[1,128], index: 0, kind: input, shape index: {}]   ;;  %s363_s1 = inlined_call_operand.hbm [shape: f32[128,256], index: 1, kind: input, shape index: {}]   ;;  %s364_s2 = inlined_call_operand.vmem [shape: f32[1,256], index: 2, kind: input, shape index: {}]   ;;  %s365_s3 = inlined_call_operand.hbm [shape: f32[1,1], index: 3, kind: output, shape index: {}]  }
   0x1   :  { %9 = vsyncpa [#allocation6], 0 }
   0x2   :  { %10 = vsyncpa [#allocation4], 0  ;;  %s290_s12 = smov [#allocation2]   ;;  %s291_s14 = smov [#allocation5]  }
   0x3   :  { %s17_s13 = sshll.u32 %s290_s12, 4  ;;  %s26_s15 = sshll.u32 %s291_s14, 4  ;;  %s18_s13 = int_to_ptr.vmem [resolvable:$true] %s17_s13  ;;  %s316_s15 = int_to_ptr.vmem [resolvable:$true] %s26_s15 }
   0x4   :  { %s218_s18 = scalar_lea.hbm %s362_s0, 16 }
   0x5   :  { %p219_p0 = scmp.ne.s32.totalorder %s362_s0, %s218_s18  ;;  %p222_p1 = scmp.lt.u32.totalorder %s218_s18, %s362_s0 }
   0x7   :  { %p224_p2 = pnand %p222_p1, %p219_p0 }
   0x9   :  { %227 = shalt.err (!%p224_p2)
}
   0xa   :  { %s228_s23 = scalar_lea.vmem %s18_s13, 16  ;;  %s232_s24 = scalar_lea.vmem %s18_s13, 32 }
   0xb   :  { %p229_p3 = scmp.ne.s32.totalorder %s18_s13, %s228_s23  ;;  %p233_p4 = scmp.lt.s32.totalorder %s18_s13, %s18_s13 }
   0xc   :  { %p234_p5 = scmp.lt.s32.totalorder %s232_s24, %s228_s23 }
   0xe   :  { %p235_p6 = por %p234_p5, %p233_p4 }
  0x10   :  { %p236_p7 = pnand %p235_p6, %p229_p3 }
  0x12   :  { %239 = shalt.err (!%p236_p7)
}
  0x13   :  { %20 = dma.hbm_to_vmem [thread:$0]  %s362_s0, 16, %s18_s13, [#allocation3]  }
  0x14   :  { %s240_s29 = scalar_lea.hbm %s363_s1, 4096 }
  0x15   :  { %p241_p8 = scmp.ne.s32.totalorder %s363_s1, %s240_s29  ;;  %p244_p9 = scmp.lt.u32.totalorder %s240_s29, %s363_s1 }
  0x17   :  { %p246_p10 = pnand %p244_p9, %p241_p8 }
  0x19   :  { %249 = shalt.err (!%p246_p10)
}
  0x1a   :  { %s250_s7 = scalar_lea.vmem %s316_s15, 4096  ;;  %p255_p12 = scmp.lt.s32.totalorder %s316_s15, %s316_s15 }
  0x1b   :  { %p251_p11 = scmp.ne.s32.totalorder %s316_s15, %s250_s7  ;;  %p256_p13 = scmp.lt.s32.totalorder %s250_s7, %s250_s7 }
  0x1d   :  { %p257_p0 = por %p256_p13, %p255_p12 }
  0x1f   :  { %p258_p1 = pnand %p257_p0, %p251_p11 }
  0x21   :  { %261 = shalt.err (!%p258_p1)
}
  0x22   :  { %s292_s0 = smov 256   ;;  %s293_s8 = smov 16  }
  0x23   :  { %32 = dma.hbm_to_vmem [thread:$0]  %s363_s1, 4096, %s316_s15, [#allocation6], %s292_s0, %s292_s0, %s293_s8  }
  0x24   :  { %284 = dma.done.wait [#allocation3], 16  }
  0x25   :  { %285 = vsyncadd [#allocation3], 4294967280 }
  0x26   :  { %286 = dma.done.wait [#allocation6], 4096  }
  0x27   :  { %287 = vsyncadd [#allocation6], 4294963200  ;;  %v294_v0 = vmov 0.0   ;;  %v43_v1 = vld [vmem:[#allocation5 + $0x8] sm:$0xff]  ;;  %v45_v2 = vld [vmem:[#allocation5 + $0x18] sm:$0xff]  ;;  %v76_v50 = vlaneseq  ;;  %vm158_vm0 = vcmask 1040384  }
  0x28   :  { %150 = vmatprep.mubr.f32.mxu0 %v294_v0  ;;  %v42_v3 = vld [vmem:[#allocation5] sm:$0xff]  ;;  %v180_v4 = vpack.c.bf16 %v45_v2, %v43_v1  ;;  %v44_v5 = vld [vmem:[#allocation5 + $0x10] sm:$0xff]  ;;  %v47_v6 = vld [vmem:[#allocation5 + $0x28] sm:$0xff]  ;;  %s295_s12 = smov [#allocation7]   ;;  %vm162_vm1 = vcmask 0  }
  0x29   :  { %v49_v7 = vld [vmem:[#allocation5 + $0x38] sm:$0xff]  ;;  %v182_v8 = vpack.c.bf16 %v44_v5, %v42_v3  ;;  %v46_v10 = vld [vmem:[#allocation5 + $0x20] sm:$0xff]  ;;  %v48_v11 = vld [vmem:[#allocation5 + $0x30] sm:$0xff]  ;;  %v77_v51 = vshrl.u32 %v76_v50, 7  ;;  %s170_s13 = sshll.u32 %s295_s12, 4  ;;  %s171_s13 = int_to_ptr.vmem [resolvable:$true] %s170_s13 }
  0x2a   :  { %v184_v9 = vpack.c.bf16 %v49_v7, %v47_v6  ;;  %v51_v12 = vld [vmem:[#allocation5 + $0x48] sm:$0xff]  ;;  %181 = vmatprep.subr.bf16.mxu0 %v180_v4  ;;  %v53_v13 = vld [vmem:[#allocation5 + $0x58] sm:$0xff]  ;;  %v186_v14 = vpack.c.bf16 %v48_v11, %v46_v10  ;;  %v50_v16 = vld [vmem:[#allocation5 + $0x40] sm:$0xff]  ;;  %s262_s14 = scalar_lea.vmem %s171_s13, 16  ;;  %p267_p3 = scmp.lt.s32.totalorder %s171_s13, %s171_s13 }
  0x2b   :  { %183 = vmatpush1.bf16.msra.mxu0 %v182_v8  ;;  %v188_v15 = vpack.c.bf16 %v53_v13, %v51_v12  ;;  %v52_v17 = vld [vmem:[#allocation5 + $0x50] sm:$0xff]  ;;  %v55_v18 = vld [vmem:[#allocation5 + $0x68] sm:$0xff]  ;;  %v57_v19 = vld [vmem:[#allocation5 + $0x78] sm:$0xff]  ;;  %v78_v52 = vsub.s32 0, %v77_v51  ;;  %v82_v54 = vsub.s32 1, %v77_v51  ;;  %p263_p2 = scmp.ne.s32.totalorder %s171_s13, %s262_s14 }
  0x2c   :  { %185 = vmatprep.subr.bf16.mxu0 %v184_v9  ;;  %v190_v20 = vpack.c.bf16 %v52_v17, %v50_v16  ;;  %v192_v21 = vpack.c.bf16 %v57_v19, %v55_v18  ;;  %v54_v22 = vld [vmem:[#allocation5 + $0x60] sm:$0xff]  ;;  %v56_v23 = vld [vmem:[#allocation5 + $0x70] sm:$0xff]  ;;  %v59_v24 = vld [vmem:[#allocation5 + $0x88] sm:$0xff] }
  0x2d   :  { %v61_v25 = vld [vmem:[#allocation5 + $0x98] sm:$0xff]  ;;  %v194_v26 = vpack.c.bf16 %v56_v23, %v54_v22  ;;  %v58_v28 = vld [vmem:[#allocation5 + $0x80] sm:$0xff]  ;;  %v60_v29 = vld [vmem:[#allocation5 + $0x90] sm:$0xff] }
  0x2e   :  { %v196_v27 = vpack.c.bf16 %v61_v25, %v59_v24  ;;  %v63_v30 = vld [vmem:[#allocation5 + $0xa8] sm:$0xff]  ;;  %v65_v31 = vld [vmem:[#allocation5 + $0xb8] sm:$0xff]  ;;  %v198_v32 = vpack.c.bf16 %v60_v29, %v58_v28  ;;  %v62_v34 = vld [vmem:[#allocation5 + $0xa0] sm:$0xff] }
  0x2f   :  { %187 = vmatpush1.bf16.msra.mxu0 %v186_v14  ;;  %v200_v33 = vpack.c.bf16 %v65_v31, %v63_v30  ;;  %v64_v35 = vld [vmem:[#allocation5 + $0xb0] sm:$0xff]  ;;  %v67_v36 = vld [vmem:[#allocation5 + $0xc8] sm:$0xff]  ;;  %v69_v37 = vld [vmem:[#allocation5 + $0xd8] sm:$0xff] }
  0x30   :  { %189 = vmatprep.subr.bf16.mxu0 %v188_v15  ;;  %v202_v38 = vpack.c.bf16 %v64_v35, %v62_v34  ;;  %v204_v39 = vpack.c.bf16 %v69_v37, %v67_v36  ;;  %v66_v40 = vld [vmem:[#allocation5 + $0xc0] sm:$0xff]  ;;  %v68_v41 = vld [vmem:[#allocation5 + $0xd0] sm:$0xff]  ;;  %v71_v42 = vld [vmem:[#allocation5 + $0xe8] sm:$0xff] }
  0x31   :  { %v73_v43 = vld [vmem:[#allocation5 + $0xf8] sm:$0xff]  ;;  %v206_v44 = vpack.c.bf16 %v68_v41, %v66_v40  ;;  %v70_v46 = vld [vmem:[#allocation5 + $0xe0] sm:$0xff]  ;;  %v72_v47 = vld [vmem:[#allocation5 + $0xf0] sm:$0xff] }
  0x32   :  { %v208_v45 = vpack.c.bf16 %v73_v43, %v71_v42  ;;  %v210_v48 = vpack.c.bf16 %v72_v47, %v70_v46  ;;  %v41_v49 = vld [vmem:[#allocation2] sm:$0x1]  ;;  %v74_v53 = vld [vmem:[%s364_s2] sm:$0x3]  ;;  %s266_s2 = scalar_lea.vmem %s171_s13, 32 }
  0x33   :  { %191 = vmatpush1.bf16.msra.mxu0 %v190_v20  ;;  %v79_v55 = vrot.slane %v74_v53, %v78_v52  ;;  %v83_v56 = vrot.slane %v74_v53, %v82_v54  ;;  %p268_p4 = scmp.lt.s32.totalorder %s266_s2, %s262_s14 }
  0x34   :  { %193 = vmatprep.subr.bf16.mxu0 %v192_v21 }
  0x35   :  { %p269_p5 = por %p268_p4, %p267_p3 }
  0x37   :  { %195 = vmatpush1.bf16.msra.mxu0 %v194_v26  ;;  %p270_p6 = pnand %p269_p5, %p263_p2 }
  0x38   :  { %197 = vmatprep.subr.bf16.mxu0 %v196_v27 }
  0x3b   :  { %199 = vmatpush1.bf16.msra.mxu0 %v198_v32 }
  0x3c   :  { %201 = vmatprep.subr.bf16.mxu0 %v200_v33 }
  0x3f   :  { %203 = vmatpush1.bf16.msra.mxu0 %v202_v38 }
  0x40   :  { %205 = vmatprep.subr.bf16.mxu0 %v204_v39 }
  0x43   :  { %207 = vmatpush1.bf16.msra.mxu0 %v206_v44 }
  0x44   :  { %209 = vmatprep.subr.bf16.mxu0 %v208_v45 }
  0x47   :  { %211 = vmatpush1.bf16.msra.mxu0 %v210_v48 }
  0x4a   :  { %151 = vmatmul.mubr.f32.vlgmr.msra.gmra.mrb[0].mxu0 %v41_v49 }
 0x11d   :  { %v152_v57 = vpop.f32.mrb[0].mxu0 }
 0x11e   :  { %v153_v58 = vadd.f32 %v152_v57, %v79_v55  ;;  %v154_v59 = vpop.f32.mrb[1].mxu0 }
 0x11f   :  { %v155_v60 = vadd.f32 %v154_v59, %v83_v56 }
 0x121   :  { %v157_v61 = vmul.f32 %v155_v60, %v153_v58 }
 0x123   :  { %v159_v62 = vsel %vm158_vm0, %v157_v61, 0.0 }
 0x124   :  { %160 = vadd.xlane.f32.xlu0 %v159_v62 }
 0x1b1   :  { %v161_v63 = vpop.xlane.xlu0 %160 }
 0x1b2   :  { %163 = vst.msk [vmem:[#allocation7] sm:$0x1] %vm162_vm1, %v161_v63 }
 0x1b3   :  { %273 = shalt.err (!%p270_p6)
}
 0x1b4   :  { %s274_s17 = scalar_lea.hbm %s365_s3, 16 }
 0x1b5   :  { %p275_p7 = scmp.ne.s32.totalorder %s365_s3, %s274_s17  ;;  %p278_p8 = scmp.lt.u32.totalorder %s274_s17, %s365_s3 }
 0x1b7   :  { %p280_p9 = pnand %p278_p8, %p275_p7 }
 0x1b9   :  { %283 = shalt.err (!%p280_p9)
}
 0x1ba   :  { %173 = dma.vmem_to_hbm [thread:$0]  %s171_s13, 16, %s365_s3, [#allocation4]  }
 0x1bb   :  { %288 = dma.done.wait [#allocation4], 16  }
 0x1bc   :  { %289 = vsyncadd [#allocation4], 4294967280 }
 0x1bd   :  { %177 = vsyncpa [#allocation3], 1 }
 0x1be   :  { %178 = vsyncpa [#allocation6], 1 }
 0x1bf   :  { %179 = vsyncpa [#allocation4], 1 }

</bundles_post_ra>
